<compile_context>
chip_gen: v5e
topology: v5e:2x2
jax: 0.10.0
libtpu: 0.0.40
codegen_flags: <defaults>
</compile_context>

<pallas_src>
import jax
import jax.numpy as jnp
from jax import lax
from jax.experimental import pallas as pl
from jax.experimental.pallas import tpu as pltpu


def _posconv_kernel(x_ref, w_ref, b_ref, o_ref):
    # x_ref : (1, H, W, C)  one image, NHWC
    # w_ref : (9, C)        depthwise 3x3 taps, row = ky*3 + kx
    # b_ref : (1, C)        bias
    # o_ref : (1, H, W, C)  output image
    H, W, C = o_ref.shape[1], o_ref.shape[2], o_ref.shape[3]

    x = x_ref[0]                                    # (H, W, C), input dtype
    w = w_ref[...].astype(jnp.float32)              # (9, C)  cast hoisted out of tap loop
    b = b_ref[...].astype(jnp.float32)              # (1, C)

    # Column-shifted copies (dx taps), zero-filled at the left/right borders.
    # Built once per step; all nine taps reuse these three arrays.
    zcol = jnp.zeros((H, 1, C), x.dtype)
    x_l = jnp.concatenate([zcol, x[:, :W - 1, :]], axis=1)   # value at w is x[:, w-1]
    x_r = jnp.concatenate([x[:, 1:, :], zcol], axis=1)       # value at w is x[:, w+1]
    cols = (x_l, x, x_r)                                     # indexed by kx

    zrow = jnp.zeros((1, W, C), x.dtype)

    # Accumulator starts with residual (stride == 1) + broadcast bias.
    acc = x.astype(jnp.float32) + b                          # (H, W, C) f32

    # 9-tap depthwise MAC; dy shifts are cheap outer-dim concats of the three
    # column-shifted arrays (channels broadcast on the 128-lane axis).
    for ky in range(3):
        for kx in range(3):
            col = cols[kx]
            if ky == 0:       # needs x[h-1, w+kx-1]
                tap = jnp.concatenate([zrow, col[:H - 1]], axis=0)
            elif ky == 1:     # x[h, w+kx-1]
                tap = col
            else:             # x[h+1, w+kx-1]
                tap = jnp.concatenate([col[1:], zrow], axis=0)
            acc = acc + tap.astype(jnp.float32) * w[ky * 3 + kx]

    o_ref[0] = acc.astype(o_ref.dtype)


def pos_conv_nhwc(x, weight, bias, stride=1):
    """PosConv forward in NHWC layout.

    x      : (N, H, W, C) float32 or bfloat16
    weight : (C, 1, 3, 3) depthwise conv weight (PyTorch OIHW layout)
    bias   : (C,)
    """
    if stride != 1:
        # TODO(synk): strided PosConv (no residual) is never used by this model; not implemented.
        raise NotImplementedError("PosConv Pallas kernel implemented for stride=1 only")

    N, H, W, C = x.shape
    w_taps = jnp.reshape(weight[:, 0, :, :], (C, 9)).T        # (9, C), row = ky*3 + kx
    b2 = jnp.reshape(bias, (1, C))                            # (1, C)

    # Full-image tiles: one grid step per image, no halo reads, batch axis is
    # "parallel" so batch >= 2 keeps both v7x TensorCores busy.  Working set
    # (2x double-buffered in/out tiles + weights) is well under the default
    # scoped-VMEM limit on all generations, so no vmem_limit_bytes override.
    # TODO(synk): re-introduce row tiling if H*W*C ever grows past a few MiB.
    return pl.pallas_call(
        _posconv_kernel,
        out_shape=jax.ShapeDtypeStruct((N, H, W, C), x.dtype),
        grid=(N,),
        in_specs=[
            pl.BlockSpec((1, H, W, C), lambda n: (n, 0, 0, 0)),
            pl.BlockSpec((9, C), lambda n: (0, 0)),
            pl.BlockSpec((1, C), lambda n: (0, 0)),
        ],
        out_specs=pl.BlockSpec((1, H, W, C), lambda n: (n, 0, 0, 0)),
        compiler_params=pltpu.CompilerParams(
            dimension_semantics=("parallel",),
        ),
    )(x, w_taps, b2)


def pos_conv(x_nchw, weight, bias, stride=1):
    """Drop-in PyTorch-layout (NCHW) wrapper; the kernel itself runs NHWC."""
    x = jnp.transpose(x_nchw, (0, 2, 3, 1))
    y = pos_conv_nhwc(x, weight, bias, stride=stride)
    return jnp.transpose(y, (0, 3, 1, 2))


def _reference_pos_conv_nhwc(x, weight, bias):
    """Pure-JAX reference: depthwise conv (feature_group_count) + bias + residual."""
    C = x.shape[-1]
    w_hwio = jnp.transpose(weight, (2, 3, 1, 0))              # (3, 3, 1, C)
    y = lax.conv_general_dilated(
        x, w_hwio,
        window_strides=(1, 1), padding=((1, 1), (1, 1)),
        dimension_numbers=("NHWC", "HWIO", "NHWC"),
        feature_group_count=C)
    return y + bias[None, None, None, :] + x


if __name__ == "__main__":
    key = jax.random.PRNGKey(0)
    k_x, k_w, k_b = jax.random.split(key, 3)

    # 14x14 token grid as in PoolingTransformer; C kept a multiple of 128 so
    # stores are lane-dense (unmasked vst).  N=2 -> two parallel grid steps.
    N, C, H, W = 2, 128, 14, 14
    bound = 1.0 / (3.0 * 3.0) ** 0.5
    weight = jax.random.uniform(k_w, (C, 1, 3, 3), jnp.float32, -bound, bound)
    bias = jax.random.uniform(k_b, (C,), jnp.float32, -bound, bound)

    # Preferred NHWC path (no layout passes around the kernel).
    x_nhwc = jax.random.normal(k_x, (N, H, W, C), jnp.float32)
    out = jax.block_until_ready(pos_conv_nhwc(x_nhwc, weight, bias))
    ref = jax.block_until_ready(_reference_pos_conv_nhwc(x_nhwc, weight, bias))
    assert out.shape == (N, H, W, C)
    assert jnp.allclose(out, ref, atol=1e-4, rtol=1e-4), "NHWC mismatch vs reference"

    # PyTorch-layout (NCHW) parity check.
    x_nchw = jnp.transpose(x_nhwc, (0, 3, 1, 2))
    out_nchw = jax.block_until_ready(pos_conv(x_nchw, weight, bias))
    ref_nchw = jnp.transpose(ref, (0, 3, 1, 2))
    assert out_nchw.shape == (N, C, H, W)
    assert jnp.allclose(out_nchw, ref_nchw, atol=1e-4, rtol=1e-4), "NCHW mismatch vs reference"

    print("KERNEL_OK")
</pallas_src>

<mosaic_0001>
module attributes {stable_mosaic.version = 11 : i64} {
  func.func @_posconv_kernel(%arg0: i32, %arg1: memref<1x14x14x128xf32, #tpu.memory_space<vmem>>, %arg2: memref<9x128xf32, #tpu.memory_space<vmem>>, %arg3: memref<1x128xf32, #tpu.memory_space<vmem>>, %arg4: memref<1x14x14x128xf32, #tpu.memory_space<vmem>>) attributes {dimension_semantics = [#tpu.dimension_semantics<parallel>], iteration_bounds = array<i64: 2>, scalar_prefetch = 0 : i64, scratch_operands = 0 : i64, tpu.core_type = #tpu.core_type<tc>, window_params = [{transform_indices = @transform_0, window_bounds = array<i64: 1, 14, 14, 128>}, {pipeline_mode = #tpu.pipeline_mode<synchronous>, transform_indices = @transform_1, window_bounds = array<i64: 9, 128>}, {pipeline_mode = #tpu.pipeline_mode<synchronous>, transform_indices = @transform_2, window_bounds = array<i64: 1, 128>}, {transform_indices = @transform_3, window_bounds = array<i64: 1, 14, 14, 128>}]} {
    %c0 = arith.constant 0 : index
    %c0_0 = arith.constant 0 : index
    %c0_1 = arith.constant 0 : index
    %c0_2 = arith.constant 0 : index
    %0 = vector.load %arg1[%c0, %c0_0, %c0_1, %c0_2] : memref<1x14x14x128xf32, #tpu.memory_space<vmem>>, vector<1x14x14x128xf32>
    %1 = vector.shape_cast %0 : vector<1x14x14x128xf32> to vector<14x14x128xf32>
    %c0_3 = arith.constant 0 : index
    %c0_4 = arith.constant 0 : index
    %2 = vector.load %arg2[%c0_3, %c0_4] : memref<9x128xf32, #tpu.memory_space<vmem>>, vector<9x128xf32>
    %c0_5 = arith.constant 0 : index
    %c0_6 = arith.constant 0 : index
    %3 = vector.load %arg3[%c0_5, %c0_6] : memref<1x128xf32, #tpu.memory_space<vmem>>, vector<1x128xf32>
    %cst = arith.constant 0.000000e+00 : f32
    %4 = vector.broadcast %cst : f32 to vector<14x1x128xf32>
    %5 = vector.extract_strided_slice %1 {offsets = [0, 0, 0], sizes = [14, 13, 128], strides = [1, 1, 1]} : vector<14x14x128xf32> to vector<14x13x128xf32>
    %6 = tpu.concatenate %4, %5 in 1 : vector<14x1x128xf32>, vector<14x13x128xf32> -> vector<14x14x128xf32>
    %7 = vector.extract_strided_slice %1 {offsets = [0, 1, 0], sizes = [14, 13, 128], strides = [1, 1, 1]} : vector<14x14x128xf32> to vector<14x13x128xf32>
    %8 = tpu.concatenate %7, %4 in 1 : vector<14x13x128xf32>, vector<14x1x128xf32> -> vector<14x14x128xf32>
    %cst_7 = arith.constant 0.000000e+00 : f32
    %9 = vector.broadcast %cst_7 : f32 to vector<1x14x128xf32>
    %10 = vector.shape_cast %3 : vector<1x128xf32> to vector<1x1x128xf32>
    %11 = vector.broadcast %10 : vector<1x1x128xf32> to vector<14x14x128xf32>
    %12 = arith.addf %1, %11 : vector<14x14x128xf32>
    %13 = vector.extract_strided_slice %6 {offsets = [0, 0, 0], sizes = [13, 14, 128], strides = [1, 1, 1]} : vector<14x14x128xf32> to vector<13x14x128xf32>
    %14 = tpu.concatenate %9, %13 in 0 : vector<1x14x128xf32>, vector<13x14x128xf32> -> vector<14x14x128xf32>
    %15 = vector.extract_strided_slice %2 {offsets = [0, 0], sizes = [1, 128], strides = [1, 1]} : vector<9x128xf32> to vector<1x128xf32>
    %16 = vector.shape_cast %15 : vector<1x128xf32> to vector<128xf32>
    %17 = vector.shape_cast %16 : vector<128xf32> to vector<1x1x128xf32>
    %18 = vector.broadcast %17 : vector<1x1x128xf32> to vector<14x14x128xf32>
    %19 = arith.mulf %14, %18 : vector<14x14x128xf32>
    %20 = arith.addf %12, %19 : vector<14x14x128xf32>
    %21 = vector.extract_strided_slice %1 {offsets = [0, 0, 0], sizes = [13, 14, 128], strides = [1, 1, 1]} : vector<14x14x128xf32> to vector<13x14x128xf32>
    %22 = tpu.concatenate %9, %21 in 0 : vector<1x14x128xf32>, vector<13x14x128xf32> -> vector<14x14x128xf32>
    %23 = vector.extract_strided_slice %2 {offsets = [1, 0], sizes = [1, 128], strides = [1, 1]} : vector<9x128xf32> to vector<1x128xf32>
    %24 = vector.shape_cast %23 : vector<1x128xf32> to vector<128xf32>
    %25 = vector.shape_cast %24 : vector<128xf32> to vector<1x1x128xf32>
    %26 = vector.broadcast %25 : vector<1x1x128xf32> to vector<14x14x128xf32>
    %27 = arith.mulf %22, %26 : vector<14x14x128xf32>
    %28 = arith.addf %20, %27 : vector<14x14x128xf32>
    %29 = vector.extract_strided_slice %8 {offsets = [0, 0, 0], sizes = [13, 14, 128], strides = [1, 1, 1]} : vector<14x14x128xf32> to vector<13x14x128xf32>
    %30 = tpu.concatenate %9, %29 in 0 : vector<1x14x128xf32>, vector<13x14x128xf32> -> vector<14x14x128xf32>
    %31 = vector.extract_strided_slice %2 {offsets = [2, 0], sizes = [1, 128], strides = [1, 1]} : vector<9x128xf32> to vector<1x128xf32>
    %32 = vector.shape_cast %31 : vector<1x128xf32> to vector<128xf32>
    %33 = vector.shape_cast %32 : vector<128xf32> to vector<1x1x128xf32>
    %34 = vector.broadcast %33 : vector<1x1x128xf32> to vector<14x14x128xf32>
    %35 = arith.mulf %30, %34 : vector<14x14x128xf32>
    %36 = arith.addf %28, %35 : vector<14x14x128xf32>
    %37 = vector.extract_strided_slice %2 {offsets = [3, 0], sizes = [1, 128], strides = [1, 1]} : vector<9x128xf32> to vector<1x128xf32>
    %38 = vector.shape_cast %37 : vector<1x128xf32> to vector<128xf32>
    %39 = vector.shape_cast %38 : vector<128xf32> to vector<1x1x128xf32>
    %40 = vector.broadcast %39 : vector<1x1x128xf32> to vector<14x14x128xf32>
    %41 = arith.mulf %6, %40 : vector<14x14x128xf32>
    %42 = arith.addf %36, %41 : vector<14x14x128xf32>
    %43 = vector.extract_strided_slice %2 {offsets = [4, 0], sizes = [1, 128], strides = [1, 1]} : vector<9x128xf32> to vector<1x128xf32>
    %44 = vector.shape_cast %43 : vector<1x128xf32> to vector<128xf32>
    %45 = vector.shape_cast %44 : vector<128xf32> to vector<1x1x128xf32>
    %46 = vector.broadcast %45 : vector<1x1x128xf32> to vector<14x14x128xf32>
    %47 = arith.mulf %1, %46 : vector<14x14x128xf32>
    %48 = arith.addf %42, %47 : vector<14x14x128xf32>
    %49 = vector.extract_strided_slice %2 {offsets = [5, 0], sizes = [1, 128], strides = [1, 1]} : vector<9x128xf32> to vector<1x128xf32>
    %50 = vector.shape_cast %49 : vector<1x128xf32> to vector<128xf32>
    %51 = vector.shape_cast %50 : vector<128xf32> to vector<1x1x128xf32>
    %52 = vector.broadcast %51 : vector<1x1x128xf32> to vector<14x14x128xf32>
    %53 = arith.mulf %8, %52 : vector<14x14x128xf32>
    %54 = arith.addf %48, %53 : vector<14x14x128xf32>
    %55 = vector.extract_strided_slice %6 {offsets = [1, 0, 0], sizes = [13, 14, 128], strides = [1, 1, 1]} : vector<14x14x128xf32> to vector<13x14x128xf32>
    %56 = tpu.concatenate %55, %9 in 0 : vector<13x14x128xf32>, vector<1x14x128xf32> -> vector<14x14x128xf32>
    %57 = vector.extract_strided_slice %2 {offsets = [6, 0], sizes = [1, 128], strides = [1, 1]} : vector<9x128xf32> to vector<1x128xf32>
    %58 = vector.shape_cast %57 : vector<1x128xf32> to vector<128xf32>
    %59 = vector.shape_cast %58 : vector<128xf32> to vector<1x1x128xf32>
    %60 = vector.broadcast %59 : vector<1x1x128xf32> to vector<14x14x128xf32>
    %61 = arith.mulf %56, %60 : vector<14x14x128xf32>
    %62 = arith.addf %54, %61 : vector<14x14x128xf32>
    %63 = vector.extract_strided_slice %1 {offsets = [1, 0, 0], sizes = [13, 14, 128], strides = [1, 1, 1]} : vector<14x14x128xf32> to vector<13x14x128xf32>
    %64 = tpu.concatenate %63, %9 in 0 : vector<13x14x128xf32>, vector<1x14x128xf32> -> vector<14x14x128xf32>
    %65 = vector.extract_strided_slice %2 {offsets = [7, 0], sizes = [1, 128], strides = [1, 1]} : vector<9x128xf32> to vector<1x128xf32>
    %66 = vector.shape_cast %65 : vector<1x128xf32> to vector<128xf32>
    %67 = vector.shape_cast %66 : vector<128xf32> to vector<1x1x128xf32>
    %68 = vector.broadcast %67 : vector<1x1x128xf32> to vector<14x14x128xf32>
    %69 = arith.mulf %64, %68 : vector<14x14x128xf32>
    %70 = arith.addf %62, %69 : vector<14x14x128xf32>
    %71 = vector.extract_strided_slice %8 {offsets = [1, 0, 0], sizes = [13, 14, 128], strides = [1, 1, 1]} : vector<14x14x128xf32> to vector<13x14x128xf32>
    %72 = tpu.concatenate %71, %9 in 0 : vector<13x14x128xf32>, vector<1x14x128xf32> -> vector<14x14x128xf32>
    %73 = vector.extract_strided_slice %2 {offsets = [8, 0], sizes = [1, 128], strides = [1, 1]} : vector<9x128xf32> to vector<1x128xf32>
    %74 = vector.shape_cast %73 : vector<1x128xf32> to vector<128xf32>
    %75 = vector.shape_cast %74 : vector<128xf32> to vector<1x1x128xf32>
    %76 = vector.broadcast %75 : vector<1x1x128xf32> to vector<14x14x128xf32>
    %77 = arith.mulf %72, %76 : vector<14x14x128xf32>
    %78 = arith.addf %70, %77 : vector<14x14x128xf32>
    %c0_8 = arith.constant 0 : index
    %c0_9 = arith.constant 0 : index
    %c0_10 = arith.constant 0 : index
    %c0_11 = arith.constant 0 : index
    %79 = vector.load %arg4[%c0_8, %c0_9, %c0_10, %c0_11] : memref<1x14x14x128xf32, #tpu.memory_space<vmem>>, vector<1x14x14x128xf32>
    %80 = vector.shape_cast %79 : vector<1x14x14x128xf32> to vector<14x14x128xf32>
    %81 = vector.shape_cast %78 : vector<14x14x128xf32> to vector<1x14x14x128xf32>
    tpu.vector_store %arg4[%c0_8, %c0_9, %c0_10, %c0_11], %81 {strides = array<i32>} : memref<1x14x14x128xf32, #tpu.memory_space<vmem>>, vector<1x14x14x128xf32>,
    return
  }
  func.func @transform_0(%arg0: i32) -> (i32, i32, i32, i32) {
    %c0_i32 = arith.constant 0 : i32
    %c0_i32_0 = arith.constant 0 : i32
    %c0_i32_1 = arith.constant 0 : i32
    %c0_i32_2 = arith.constant 0 : i32
    return %arg0, %c0_i32, %c0_i32_0, %c0_i32_1 : i32, i32, i32, i32
  }
  func.func @transform_1(%arg0: i32) -> (i32, i32) {
    %c0_i32 = arith.constant 0 : i32
    %c0_i32_0 = arith.constant 0 : i32
    %c0_i32_1 = arith.constant 0 : i32
    return %c0_i32, %c0_i32_0 : i32, i32
  }
  func.func @transform_2(%arg0: i32) -> (i32, i32) {
    %c0_i32 = arith.constant 0 : i32
    %c0_i32_0 = arith.constant 0 : i32
    %c0_i32_1 = arith.constant 0 : i32
    return %c0_i32, %c0_i32_0 : i32, i32
  }
  func.func @transform_3(%arg0: i32) -> (i32, i32, i32, i32) {
    %c0_i32 = arith.constant 0 : i32
    %c0_i32_0 = arith.constant 0 : i32
    %c0_i32_1 = arith.constant 0 : i32
    %c0_i32_2 = arith.constant 0 : i32
    return %arg0, %c0_i32, %c0_i32_0, %c0_i32_1 : i32, i32, i32, i32
  }
}

</mosaic_0001>

<bundles_post_ra>
// kernel: tpu_custom_call.1
= control target key start
LH: loop header
LB: loop body
LE: loop exit
PB: predicated region body
PF: predicated region fallthrough
CT: control target
= control target key end

     0   :  { %s1072_s12 = smov 0   ;;  %s1808_s0 = inlined_call_operand.vmem [shape: f32[2,14,14,128], index: 0, kind: input, shape index: {}]   ;;  %s1809_s1 = inlined_call_operand.vmem [shape: f32[9,128], index: 1, kind: input, shape index: {}]   ;;  %s1810_s2 = inlined_call_operand.vmem [shape: f32[1,128], index: 2, kind: input, shape index: {}]   ;;  %s1811_s3 = inlined_call_operand.vmem [shape: f32[2,14,14,128], index: 3, kind: output, shape index: {}]  }
   0x1 LB: > { %s1022_s13 = sadd.s32 4294967295, %s1050_s12   ;;  %p1026_p0 = scmp.ge.s32.totalorder %s1050_s12, 1  ;;  %s1050_s12 = sphi %s1072_s12, %s13_s12  }
   0x2   : > { %p137_p1 = scmp.lt.s32.totalorder %s1050_s12, 3 }
   0x4   : > { %p138_p2 = pnand %p1026_p0, %p137_p1 }
   0x5   : > { %p161_p3 = scmp.lt.s32.totalorder (!%p138_p2), %s1022_s13, 1 }
   0x6   : > { %141 = sbr.rel (%p138_p2) target bundleno = 183 (0xb7), region = 32 }
   0xb   : > { %v199_v0 = vld [vmem:[%s1809_s1] sm:$0xff]  ;;  %s1813_s13 = smov (!%p161_p3, %s1022_s13), 1  ;;  %vm230_vm0 = vcmask 1040384   ;;  %vm315_vm1 = vcmask 1046528   ;;  %vm386_vm2 = vcmask 1044480  }
   0xc   : > { %v1085_v1 = vperm.slane %v199_v0, 0  ;;  %v1087_v2 = vperm.slane %v199_v0, 1  ;;  %s1031_s16 = smul.u32 224, %s1813_s13  ;;  %v1093_v3 = vld [vmem:[%s1810_s2] ss:$0 sm:$0xff]  ;;  %v1103_v5 = vperm.slane %v199_v0, 2 }
   0xd   : > { %v1105_v6 = vperm.slane %v199_v0, 3  ;;  %v1107_v7 = vperm.slane %v199_v0, 4  ;;  %v1119_v12 = vperm.slane %v199_v0, 5  ;;  %v1146_v33 = vperm.slane %v199_v0, 6  ;;  %v1164_v44 = vld [vmem:[%s1809_s1 + $0x8] ss:$0 sm:$0xff] }
   0xe   : > { %s1100_s21 = scalar_lea.vmem %s1808_s0, %s1031_s16  ;;  %v433_v4 = vmul.f32 0.0, %v1085_v1  ;;  %v489_v11 = vmul.f32 0.0, %v1087_v2  ;;  %v545_v26 = vmul.f32 0.0, %v1103_v5  ;;  %v1148_v34 = vperm.slane %v199_v0, 7  ;;  %s1217_s26 = scalar_lea.vmem %s1811_s3, %s1031_s16 }
   0xf   : > { %v1110_v8 = vld [vmem:[%s1100_s21] sm:$0xff]  ;;  %v1113_v9 = vld [vmem:[%s1100_s21 + $0x8] sm:$0x3f]  ;;  %v1116_v10 = vld [vmem:[%s1100_s21 + $0x10] sm:$0xff] }
  0x10   : > { %v1122_v13 = vld [vmem:[%s1100_s21 + $0x18] sm:$0x3f]  ;;  %v1125_v14 = vld [vmem:[%s1100_s21 + $0x20] sm:$0xff]  ;;  %v231_v15 = vrot.slane %v1110_v8, 7  ;;  %v234_v16 = vrot.slane %v1116_v10, 7  ;;  %v316_v17 = vrot.slane %v1110_v8, 1  ;;  %v404_v18 = vadd.f32 %v1093_v3, %v1110_v8 }
  0x11   : > { %v317_v19 = vrot.slane %v1113_v9, 1  ;;  %v319_v20 = vrot.slane %v1116_v10, 1  ;;  %v320_v21 = vrot.slane %v1122_v13, 1  ;;  %v408_v22 = vadd.f32 %v1093_v3, %v1125_v14  ;;  %v1173_v50 = vld [vmem:[%s1100_s21 + $0x28] sm:$0x3f] }
  0x12   : > { %v301_v23 = vsel %vm230_vm0, 0.0, %v231_v15  ;;  %v302_v24 = vsel %vm230_vm0, 0.0, %v234_v16  ;;  %v460_v25 = vadd.f32 %v433_v4, %v404_v18  ;;  %v492_v30 = vmul.f32 %v1087_v2, %v1116_v10 }
  0x13   : > { %v318_v27 = vsel %vm315_vm1, %v316_v17, %v317_v19  ;;  %v321_v28 = vsel %vm315_vm1, %v319_v20, %v320_v21  ;;  %v436_v29 = vmul.f32 %v1085_v1, %v302_v24  ;;  %v601_v32 = vmul.f32 %v1105_v6, %v301_v23 }
  0x14   : > { %v516_v31 = vadd.f32 %v489_v11, %v460_v25  ;;  %v434_v35 = vmul.f32 %v1085_v1, %v301_v23  ;;  %v1152_v37 = vmul.f32 %v1103_v5, %v318_v27  ;;  %v548_v38 = vmul.f32 %v1103_v5, %v321_v28 }
  0x15   : > { %v464_v36 = vadd.f32 %v436_v29, %v408_v22  ;;  %v1156_v40 = vmul.f32 %v1105_v6, %v302_v24  ;;  %v658_v41 = vmul.f32 %v1107_v7, %v1110_v8  ;;  %v715_v43 = vmul.f32 %v1119_v12, %v318_v27 }
  0x16   : > { %v572_v39 = vadd.f32 %v545_v26, %v516_v31  ;;  %v232_v45 = vrot.slane %v1113_v9, 7  ;;  %v235_v46 = vrot.slane %v1122_v13, 7  ;;  %v1169_v48 = vmul.f32 %v1119_v12, %v321_v28 }
  0x17   : > { %v520_v42 = vadd.f32 %v492_v30, %v464_v36  ;;  %v772_v49 = vmul.f32 %v1146_v33, %v302_v24  ;;  %v405_v51 = vadd.f32 %v1093_v3, %v1113_v9  ;;  %v387_v53 = vsel %vm386_vm2, %v317_v19, 0.0 }
  0x18   : > { %v629_v47 = vadd.f32 %v601_v32, %v572_v39  ;;  %v236_v52 = vsel %vm230_vm0, %v234_v16, %v235_v46  ;;  %v388_v54 = vsel %vm386_vm2, %v320_v21, 0.0  ;;  %v409_v55 = vadd.f32 %v1093_v3, %v1173_v50  ;;  %v1208_v32 = vld [vmem:[%s1100_s21 + $0x30] sm:$0xff] }
  0x19   : > { %v233_v57 = vsel %vm230_vm0, %v231_v15, %v232_v45  ;;  %v437_v58 = vmul.f32 %v1085_v1, %v236_v52  ;;  %v461_v59 = vadd.f32 %v433_v4, %v405_v51  ;;  %v1184_v60 = vadd.f32 %v548_v38, %v520_v42 }
  0x1a   : > { %v686_v56 = vadd.f32 %v658_v41, %v629_v47  ;;  %v828_v61 = vmul.f32 %v1148_v34, %v1116_v10  ;;  %v884_v62 = vmul.f32 %v1164_v44, %v321_v28  ;;  %v493_v63 = vmul.f32 %v1087_v2, %v1122_v13 }
  0x1b   : > { %v465_v16 = vadd.f32 %v437_v58, %v409_v55  ;;  %v517_v17 = vadd.f32 %v489_v11, %v461_v59  ;;  %v602_v18 = vmul.f32 %v1105_v6, %v233_v57  ;;  %v435_v15 = vmul.f32 %v1085_v1, %v233_v57 }
  0x1c   : > { %v743_v0 = vadd.f32 %v715_v43, %v686_v56  ;;  %v1194_v4 = vmul.f32 %v1103_v5, %v387_v53  ;;  %v549_v19 = vmul.f32 %v1103_v5, %v388_v54  ;;  %v1198_v20 = vmul.f32 %v1105_v6, %v236_v52 }
  0x1d   : > { %v573_v22 = vadd.f32 %v545_v26, %v517_v17  ;;  %v659_v23 = vmul.f32 %v1107_v7, %v1113_v9  ;;  %v716_v11 = vmul.f32 %v1119_v12, %v387_v53  ;;  %v773_v24 = vmul.f32 %v1146_v33, %v236_v52 }
  0x1e   : > { %v799_v21 = vadd.f32 %v772_v49, %v743_v0  ;;  %v237_v25 = vrot.slane %v1125_v14, 7  ;;  %v322_v27 = vrot.slane %v1125_v14, 1  ;;  %v323_v28 = vrot.slane %v1173_v50, 1  ;;  %v1245_v0 = vld [vmem:[%s1100_s21 + $0x38] sm:$0x3f] }
  0x1f   : > { %v521_v30 = vadd.f32 %v493_v63, %v465_v16  ;;  %v630_v31 = vadd.f32 %v602_v18, %v573_v22  ;;  %v406_v26 = vadd.f32 %v1093_v3, %v1116_v10  ;;  %v410_v39 = vadd.f32 %v1093_v3, %v1208_v32 }
  0x20   : > { %v855_v29 = vadd.f32 %v828_v61, %v799_v21  ;;  %v303_v36 = vsel %vm230_vm0, 0.0, %v237_v25  ;;  %v324_v38 = vsel %vm315_vm1, %v322_v27, %v323_v28  ;;  %v490_v41 = vmul.f32 %v1087_v2, %v1110_v8 }
  0x21   : > { %v687_v43 = vadd.f32 %v659_v23, %v630_v31  ;;  %v438_v45 = vmul.f32 %v1085_v1, %v303_v36  ;;  %v462_v46 = vadd.f32 %v434_v35, %v406_v26  ;;  %v1227_v47 = vmul.f32 %v1119_v12, %v388_v54 }
  0x22   : > { %v911_v42 = vadd.f32 %v884_v62, %v855_v29  ;;  %v829_v49 = vmul.f32 %v1148_v34, %v1122_v13  ;;  %v885_v51 = vmul.f32 %v1164_v44, %v388_v54  ;;  %v494_v52 = vmul.f32 %v1087_v2, %v1125_v14 }
  0x23   : > { %v1235_v53 = vadd.f32 %v549_v19, %v521_v30  ;;  %v744_v8 = vadd.f32 %v716_v11, %v687_v43  ;;  %v466_v55 = vadd.f32 %v438_v45, %v410_v39  ;;  %v518_v56 = vadd.f32 %v490_v41, %v462_v46 }
  0x24   : > { %939 = vst [vmem:[%s1217_s26] sm:$0xff] %v911_v42  ;;  %v550_v35 = vmul.f32 %v1103_v5, %v324_v38  ;;  %v605_v57 = vmul.f32 %v1105_v6, %v303_v36  ;;  %v660_v58 = vmul.f32 %v1107_v7, %v1116_v10  ;;  %v238_v59 = vrot.slane %v1173_v50, 7 }
  0x25   : > { %v800_v61 = vadd.f32 %v773_v24, %v744_v8  ;;  %v522_v54 = vadd.f32 %v494_v52, %v466_v55  ;;  %v574_v62 = vadd.f32 %v1152_v37, %v518_v56  ;;  %v719_v63 = vmul.f32 %v1119_v12, %v324_v38 }
  0x26   : > { %v239_v16 = vsel %vm230_vm0, %v237_v25, %v238_v59  ;;  %v407_v17 = vadd.f32 %v1093_v3, %v1122_v13  ;;  %v411_v18 = vadd.f32 %v1093_v3, %v1245_v0  ;;  %v491_v10 = vmul.f32 %v1087_v2, %v1113_v9 }
  0x27   : > { %v856_v19 = vadd.f32 %v829_v49, %v800_v61  ;;  %v631_v21 = vadd.f32 %v1156_v40, %v574_v62  ;;  %v389_v37 = vsel %vm386_vm2, %v323_v28, 0.0  ;;  %v439_v22 = vmul.f32 %v1085_v1, %v239_v16 }
  0x28   : > { %v774_v23 = vmul.f32 %v1146_v33, %v303_v36  ;;  %v830_v11 = vmul.f32 %v1148_v34, %v1125_v14  ;;  %v463_v24 = vadd.f32 %v435_v15, %v407_v17  ;;  %v495_v25 = vmul.f32 %v1087_v2, %v1173_v50 }
  0x29   : > { %v912_v27 = vadd.f32 %v885_v51, %v856_v19  ;;  %v688_v29 = vadd.f32 %v660_v58, %v631_v21  ;;  %v886_v9 = vmul.f32 %v1164_v44, %v324_v38  ;;  %v467_v30 = vadd.f32 %v439_v22, %v411_v18  ;;  %v1280_v51 = vld [vmem:[%s1100_s21 + $0x40] sm:$0xff] }
  0x2a   : > { %v1263_v31 = vadd.f32 %v550_v35, %v522_v54  ;;  %v519_v40 = vadd.f32 %v491_v10, %v463_v24  ;;  %v551_v28 = vmul.f32 %v1103_v5, %v389_v37  ;;  %v606_v26 = vmul.f32 %v1105_v6, %v239_v16 }
  0x2b   : > { %940 = vst [vmem:[%s1217_s26 + $0x8] sm:$0x3f] %v912_v27  ;;  %v745_v36 = vadd.f32 %v1169_v48, %v688_v29  ;;  %v661_v15 = vmul.f32 %v1107_v7, %v1122_v13  ;;  %v720_v39 = vmul.f32 %v1119_v12, %v389_v37  ;;  %v240_v41 = vrot.slane %v1208_v32, 7 }
  0x2c   : > { %v523_v38 = vadd.f32 %v495_v25, %v467_v30  ;;  %v575_v42 = vadd.f32 %v1194_v4, %v519_v40  ;;  %v325_v43 = vrot.slane %v1208_v32, 1  ;;  %v326_v45 = vrot.slane %v1245_v0, 1 }
  0x2d   : > { %v801_v46 = vadd.f32 %v774_v23, %v745_v36  ;;  %v775_v49 = vmul.f32 %v1146_v33, %v239_v16  ;;  %v831_v48 = vmul.f32 %v1148_v34, %v1173_v50  ;;  %v304_v13 = vsel %vm230_vm0, 0.0, %v240_v41 }
  0x2e   : > { %v632_v52 = vadd.f32 %v1198_v20, %v575_v42  ;;  %v327_v8 = vsel %vm315_vm1, %v325_v43, %v326_v45  ;;  %v412_v4 = vadd.f32 %v1093_v3, %v1280_v51  ;;  %v440_v55 = vmul.f32 %v1085_v1, %v304_v13  ;;  %v1324_v43 = vld [vmem:[%s1100_s21 + $0x50] sm:$0xff] }
  0x2f   : > { %v857_v56 = vadd.f32 %v830_v11, %v801_v46  ;;  %v887_v35 = vmul.f32 %v1164_v44, %v389_v37  ;;  %v633_v58 = vadd.f32 %v605_v57, %v1184_v60  ;;  %v662_v59 = vmul.f32 %v1107_v7, %v1125_v14  ;;  %v1302_v14 = vld [vmem:[%s1100_s21 + $0x48] sm:$0x3f] }
  0x30   : > { %v1292_v61 = vadd.f32 %v551_v28, %v523_v38  ;;  %v689_v20 = vadd.f32 %v661_v15, %v632_v52  ;;  %v496_v54 = vmul.f32 %v1087_v2, %v1208_v32  ;;  %v607_v62 = vmul.f32 %v1105_v6, %v304_v13 }
  0x31   : > { %v913_v16 = vadd.f32 %v886_v9, %v857_v56  ;;  %v552_v17 = vmul.f32 %v1103_v5, %v327_v8  ;;  %v690_v18 = vadd.f32 %v662_v59, %v633_v58  ;;  %v776_v10 = vmul.f32 %v1146_v33, %v304_v13 }
  0x32   : > { %v746_v19 = vadd.f32 %v1227_v47, %v689_v20  ;;  %v468_v60 = vadd.f32 %v440_v55, %v412_v4  ;;  %v721_v57 = vmul.f32 %v1119_v12, %v327_v8  ;;  %v241_v21 = vrot.slane %v1245_v0, 7 }
  0x33   : > { %941 = vst [vmem:[%s1217_s26 + $0x10] sm:$0xff] %v913_v16  ;;  %v747_v37 = vadd.f32 %v719_v63, %v690_v18  ;;  %v832_v22 = vmul.f32 %v1148_v34, %v1208_v32  ;;  %v390_v23 = vsel %vm386_vm2, %v326_v45, 0.0  ;;  %v413_v11 = vadd.f32 %v1093_v3, %v1302_v14 }
  0x34   : > { %v802_v24 = vadd.f32 %v775_v49, %v746_v19  ;;  %v888_v47 = vmul.f32 %v1164_v44, %v327_v8  ;;  %v242_v25 = vsel %vm230_vm0, %v240_v41, %v241_v21  ;;  %v634_v27 = vadd.f32 %v606_v26, %v1235_v53 }
  0x35   : > { %v803_v29 = vadd.f32 %v776_v10, %v747_v37  ;;  %v441_v9 = vmul.f32 %v1085_v1, %v242_v25  ;;  %v497_v63 = vmul.f32 %v1087_v2, %v1245_v0  ;;  %v663_v30 = vmul.f32 %v1107_v7, %v1173_v50  ;;  %v1351_v37 = vld [vmem:[%s1100_s21 + $0x58] sm:$0x3f] }
  0x36   : > { %v858_v40 = vadd.f32 %v831_v48, %v802_v24  ;;  %v524_v28 = vadd.f32 %v496_v54, %v468_v60  ;;  %v553_v36 = vmul.f32 %v1103_v5, %v390_v23  ;;  %v777_v15 = vmul.f32 %v1146_v33, %v242_v25 }
  0x37   : > { %v859_v38 = vadd.f32 %v832_v22, %v803_v29  ;;  %v469_v41 = vadd.f32 %v441_v9, %v413_v11  ;;  %v691_v42 = vadd.f32 %v663_v30, %v634_v27  ;;  %v833_v53 = vmul.f32 %v1148_v34, %v1245_v0 }
  0x38   : > { %v914_v26 = vadd.f32 %v887_v35, %v858_v40  ;;  %v243_v45 = vrot.slane %v1280_v51, 7  ;;  %v328_v50 = vrot.slane %v1280_v51, 1  ;;  %v329_v46 = vrot.slane %v1302_v14, 1 }
  0x39   : > { %v915_v49 = vadd.f32 %v888_v47, %v859_v38  ;;  %v525_v48 = vadd.f32 %v497_v63, %v469_v41  ;;  %v748_v13 = vadd.f32 %v720_v39, %v691_v42  ;;  %v414_v52 = vadd.f32 %v1093_v3, %v1324_v43 }
  0x3a   : > { %942 = vst [vmem:[%s1217_s26 + $0x18] sm:$0x3f] %v914_v26  ;;  %v580_v8 = vadd.f32 %v552_v17, %v524_v28  ;;  %v305_v4 = vsel %vm230_vm0, 0.0, %v243_v45  ;;  %v330_v55 = vsel %vm315_vm1, %v328_v50, %v329_v46  ;;  %v635_v56 = vadd.f32 %v607_v62, %v1263_v31 }
  0x3b   : > { %943 = vst [vmem:[%s1217_s26 + $0x20] sm:$0xff] %v915_v49  ;;  %v608_v35 = vmul.f32 %v1105_v6, %v242_v25  ;;  %v804_v58 = vadd.f32 %v777_v15, %v748_v13  ;;  %v889_v59 = vmul.f32 %v1164_v44, %v390_v23  ;;  %v442_v39 = vmul.f32 %v1085_v1, %v305_v4 }
  0x3c   : > { %v1339_v20 = vadd.f32 %v553_v36, %v525_v48  ;;  %v722_v54 = vmul.f32 %v1119_v12, %v390_v23  ;;  %v498_v16 = vmul.f32 %v1087_v2, %v1280_v51  ;;  %v664_v17 = vmul.f32 %v1107_v7, %v1208_v32 }
  0x3d   : > { %v860_v31 = vadd.f32 %v833_v53, %v804_v58  ;;  %v470_v62 = vadd.f32 %v442_v39, %v414_v52  ;;  %v554_v18 = vmul.f32 %v1103_v5, %v330_v55  ;;  %v609_v10 = vmul.f32 %v1105_v6, %v305_v4 }
  0x3e   : > { %v692_v19 = vadd.f32 %v664_v17, %v635_v56  ;;  %v723_v60 = vmul.f32 %v1119_v12, %v330_v55  ;;  %v778_v21 = vmul.f32 %v1146_v33, %v305_v4  ;;  %v244_v22 = vrot.slane %v1302_v14, 7 }
  0x3f   : > { %v916_v23 = vadd.f32 %v889_v59, %v860_v31  ;;  %v834_v32 = vmul.f32 %v1148_v34, %v1280_v51  ;;  %v391_v11 = vsel %vm386_vm2, %v329_v46, 0.0  ;;  %v415_v24 = vadd.f32 %v1093_v3, %v1351_v37 }
  0x40   : > { %v749_v47 = vadd.f32 %v721_v57, %v692_v19  ;;  %v245_v25 = vsel %vm230_vm0, %v243_v45, %v244_v22  ;;  %v636_v27 = vadd.f32 %v608_v35, %v1292_v61  ;;  %v665_v29 = vmul.f32 %v1107_v7, %v1245_v0  ;;  %v1376_v45 = vld [vmem:[%s1100_s21 + $0x60] sm:$0xff] }
  0x41   : > { %944 = vst [vmem:[%s1217_s26 + $0x28] sm:$0x3f] %v916_v23  ;;  %v526_v9 = vadd.f32 %v498_v16, %v470_v62  ;;  %v890_v63 = vmul.f32 %v1164_v44, %v330_v55  ;;  %v443_v30 = vmul.f32 %v1085_v1, %v245_v25  ;;  %v499_v40 = vmul.f32 %v1087_v2, %v1302_v14 }
  0x42   : > { %v805_v28 = vadd.f32 %v778_v21, %v749_v47  ;;  %v555_v57 = vmul.f32 %v1103_v5, %v391_v11  ;;  %v693_v36 = vadd.f32 %v665_v29, %v636_v27  ;;  %v779_v15 = vmul.f32 %v1146_v33, %v245_v25 }
  0x43   : > { %v471_v61 = vadd.f32 %v443_v30, %v415_v24  ;;  %v835_v0 = vmul.f32 %v1148_v34, %v1302_v14  ;;  %v246_v38 = vrot.slane %v1324_v43, 7  ;;  %v331_v41 = vrot.slane %v1324_v43, 1 }
  0x44   : > { %v861_v42 = vadd.f32 %v834_v32, %v805_v28  ;;  %v750_v53 = vadd.f32 %v722_v54, %v693_v36  ;;  %v891_v26 = vmul.f32 %v1164_v44, %v391_v11  ;;  %v332_v50 = vrot.slane %v1351_v37, 1 }
  0x45   : > { %v527_v46 = vadd.f32 %v499_v40, %v471_v61  ;;  %v306_v49 = vsel %vm230_vm0, 0.0, %v246_v38  ;;  %v416_v48 = vadd.f32 %v1093_v3, %v1376_v45  ;;  %v637_v13 = vadd.f32 %v609_v10, %v580_v8  ;;  %v1396_v10 = vld [vmem:[%s1100_s21 + $0x68] sm:$0x3f] }
  0x46   : > { %v917_v52 = vadd.f32 %v890_v63, %v861_v42  ;;  %v806_v4 = vadd.f32 %v779_v15, %v750_v53  ;;  %v333_v55 = vsel %vm315_vm1, %v331_v41, %v332_v50  ;;  %v444_v56 = vmul.f32 %v1085_v1, %v306_v49 }
  0x47   : > { %v582_v35 = vadd.f32 %v554_v18, %v526_v9  ;;  %v610_v58 = vmul.f32 %v1105_v6, %v245_v25  ;;  %v724_v59 = vmul.f32 %v1119_v12, %v391_v11  ;;  %v666_v39 = vmul.f32 %v1107_v7, %v1280_v51 }
  0x48   : > { %945 = vst [vmem:[%s1217_s26 + $0x30] sm:$0xff] %v917_v52  ;;  %v1389_v54 = vadd.f32 %v555_v57, %v527_v46  ;;  %v862_v16 = vadd.f32 %v835_v0, %v806_v4  ;;  %v500_v8 = vmul.f32 %v1087_v2, %v1324_v43  ;;  %v556_v17 = vmul.f32 %v1103_v5, %v333_v55 }
  0x49   : > { %v472_v31 = vadd.f32 %v444_v56, %v416_v48  ;;  %v694_v62 = vadd.f32 %v666_v39, %v637_v13  ;;  %v780_v18 = vmul.f32 %v1146_v33, %v306_v49  ;;  %v247_v19 = vrot.slane %v1351_v37, 7 }
  0x4a   : > { %v918_v21 = vadd.f32 %v891_v26, %v862_v16  ;;  %v611_v51 = vmul.f32 %v1105_v6, %v306_v49  ;;  %v392_v22 = vsel %vm386_vm2, %v332_v50, 0.0  ;;  %v417_v23 = vadd.f32 %v1093_v3, %v1396_v10 }
  0x4b   : > { %v725_v32 = vmul.f32 %v1119_v12, %v333_v55  ;;  %v751_v11 = vadd.f32 %v723_v60, %v694_v62  ;;  %v836_v24 = vmul.f32 %v1148_v34, %v1324_v43  ;;  %v248_v47 = vsel %vm230_vm0, %v246_v38, %v247_v19  ;;  %v1421_v38 = vld [vmem:[%s1100_s21 + $0x70] sm:$0xff] }
  0x4c   : > { %946 = vst [vmem:[%s1217_s26 + $0x38] sm:$0x3f] %v918_v21  ;;  %v892_v25 = vmul.f32 %v1164_v44, %v333_v55  ;;  %v445_v27 = vmul.f32 %v1085_v1, %v248_v47  ;;  %v501_v29 = vmul.f32 %v1087_v2, %v1351_v37  ;;  %v638_v9 = vadd.f32 %v610_v58, %v1339_v20  ;;  %v1445_v21 = vld [vmem:[%s1100_s21 + $0x78] sm:$0x3f] }
  0x4d   : > { %v528_v63 = vadd.f32 %v500_v8, %v472_v31  ;;  %v807_v30 = vadd.f32 %v780_v18, %v751_v11  ;;  %v557_v60 = vmul.f32 %v1103_v5, %v392_v22  ;;  %v667_v40 = vmul.f32 %v1107_v7, %v1302_v14 }
  0x4e   : > { %v473_v28 = vadd.f32 %v445_v27, %v417_v23  ;;  %v781_v57 = vmul.f32 %v1146_v33, %v248_v47  ;;  %v837_v36 = vmul.f32 %v1148_v34, %v1351_v37  ;;  %v249_v15 = vrot.slane %v1376_v45, 7 }
  0x4f   : > { %v863_v61 = vadd.f32 %v836_v24, %v807_v30  ;;  %v695_v0 = vadd.f32 %v667_v40, %v638_v9  ;;  %v334_v20 = vrot.slane %v1376_v45, 1  ;;  %v335_v41 = vrot.slane %v1396_v10, 1 }
  0x50   : > { %v529_v42 = vadd.f32 %v501_v29, %v473_v28  ;;  %v307_v14 = vsel %vm230_vm0, 0.0, %v249_v15  ;;  %v418_v53 = vadd.f32 %v1093_v3, %v1421_v38  ;;  %v502_v26 = vmul.f32 %v1087_v2, %v1376_v45 }
  0x51   : > { %v919_v50 = vadd.f32 %v892_v25, %v863_v61  ;;  %v752_v46 = vadd.f32 %v724_v59, %v695_v0  ;;  %v336_v49 = vsel %vm315_vm1, %v334_v20, %v335_v41  ;;  %v446_v48 = vmul.f32 %v1085_v1, %v307_v14 }
  0x52   : > { %v584_v13 = vadd.f32 %v556_v17, %v528_v63  ;;  %v612_v52 = vmul.f32 %v1105_v6, %v248_v47  ;;  %v726_v4 = vmul.f32 %v1119_v12, %v392_v22  ;;  %v639_v55 = vadd.f32 %v611_v51, %v582_v35 }
  0x53   : > { %947 = vst [vmem:[%s1217_s26 + $0x40] sm:$0xff] %v919_v50  ;;  %v808_v56 = vadd.f32 %v781_v57, %v752_v46  ;;  %v893_v58 = vmul.f32 %v1164_v44, %v392_v22  ;;  %v474_v39 = vadd.f32 %v446_v48, %v418_v53  ;;  %v668_v16 = vmul.f32 %v1107_v7, %v1324_v43 }
  0x54   : > { %v1438_v59 = vadd.f32 %v557_v60, %v529_v42  ;;  %v558_v8 = vmul.f32 %v1103_v5, %v336_v49  ;;  %v613_v17 = vmul.f32 %v1105_v6, %v307_v14  ;;  %v250_v31 = vrot.slane %v1396_v10, 7 }
  0x55   : > { %v864_v62 = vadd.f32 %v837_v36, %v808_v56  ;;  %v530_v18 = vadd.f32 %v502_v26, %v474_v39  ;;  %v696_v35 = vadd.f32 %v668_v16, %v639_v55  ;;  %v782_v19 = vmul.f32 %v1146_v33, %v307_v14  ;;  %v1467_v36 = vld [vmem:[%s1100_s21 + $0x80] sm:$0xff] }
  0x56   : > { %v838_v51 = vmul.f32 %v1148_v34, %v1376_v45  ;;  %v251_v43 = vsel %vm230_vm0, %v249_v15, %v250_v31  ;;  %v393_v22 = vsel %vm386_vm2, %v335_v41, 0.0  ;;  %v419_v23 = vadd.f32 %v1093_v3, %v1445_v21  ;;  %v1492_v31 = vld [vmem:[%s1100_s21 + $0x88] sm:$0x3f] }
  0x57   : > { %v920_v11 = vadd.f32 %v893_v58, %v864_v62  ;;  %v753_v24 = vadd.f32 %v725_v32, %v696_v35  ;;  %v447_v47 = vmul.f32 %v1085_v1, %v251_v43  ;;  %v503_v25 = vmul.f32 %v1087_v2, %v1396_v10 }
  0x58   : > { %v727_v27 = vmul.f32 %v1119_v12, %v336_v49  ;;  %v894_v29 = vmul.f32 %v1164_v44, %v336_v49  ;;  %v640_v9 = vadd.f32 %v612_v52, %v1389_v54  ;;  %v669_v63 = vmul.f32 %v1107_v7, %v1351_v37 }
  0x59   : > { %948 = vst [vmem:[%s1217_s26 + $0x48] sm:$0x3f] %v920_v11  ;;  %v1462_v30 = vadd.f32 %v558_v8, %v530_v18  ;;  %v809_v60 = vadd.f32 %v782_v19, %v753_v24  ;;  %v475_v40 = vadd.f32 %v447_v47, %v419_v23  ;;  %v559_v32 = vmul.f32 %v1103_v5, %v393_v22 }
  0x5a   : > { %v697_v28 = vadd.f32 %v669_v63, %v640_v9  ;;  %v783_v57 = vmul.f32 %v1146_v33, %v251_v43  ;;  %v252_v15 = vrot.slane %v1421_v38, 7  ;;  %v337_v61 = vrot.slane %v1421_v38, 1 }
  0x5b   : > { %v865_v54 = vadd.f32 %v838_v51, %v809_v60  ;;  %v531_v0 = vadd.f32 %v503_v25, %v475_v40  ;;  %v338_v37 = vrot.slane %v1445_v21, 1  ;;  %v420_v20 = vadd.f32 %v1093_v3, %v1467_v36 }
  0x5c   : > { %v754_v41 = vadd.f32 %v726_v4, %v697_v28  ;;  %v839_v42 = vmul.f32 %v1148_v34, %v1396_v10  ;;  %v308_v14 = vsel %vm230_vm0, 0.0, %v252_v15  ;;  %v641_v53 = vadd.f32 %v613_v17, %v584_v13 }
  0x5d   : > { %v921_v26 = vadd.f32 %v894_v29, %v865_v54  ;;  %v614_v50 = vmul.f32 %v1105_v6, %v251_v43  ;;  %v339_v46 = vsel %vm315_vm1, %v337_v61, %v338_v37  ;;  %v448_v49 = vmul.f32 %v1085_v1, %v308_v14 }
  0x5e   : > { %v728_v48 = vmul.f32 %v1119_v12, %v393_v22  ;;  %v810_v52 = vadd.f32 %v783_v57, %v754_v41  ;;  %v895_v55 = vmul.f32 %v1164_v44, %v393_v22  ;;  %v670_v4 = vmul.f32 %v1107_v7, %v1376_v45 }
  0x5f   : > { %949 = vst [vmem:[%s1217_s26 + $0x50] sm:$0xff] %v921_v26  ;;  %v1485_v56 = vadd.f32 %v559_v32, %v531_v0  ;;  %v476_v13 = vadd.f32 %v448_v49, %v420_v20  ;;  %v504_v58 = vmul.f32 %v1087_v2, %v1421_v38  ;;  %v560_v39 = vmul.f32 %v1103_v5, %v339_v46 }
  0x60   : > { %v866_v16 = vadd.f32 %v839_v42, %v810_v52  ;;  %v698_v8 = vadd.f32 %v670_v4, %v641_v53  ;;  %v784_v17 = vmul.f32 %v1146_v33, %v308_v14  ;;  %v253_v62 = vrot.slane %v1445_v21, 7 }
  0x61   : > { %v615_v45 = vmul.f32 %v1105_v6, %v308_v14  ;;  %v729_v18 = vmul.f32 %v1119_v12, %v339_v46  ;;  %v394_v35 = vsel %vm386_vm2, %v338_v37, 0.0  ;;  %v421_v19 = vadd.f32 %v1093_v3, %v1492_v31 }
  0x62   : > { %v922_v51 = vadd.f32 %v895_v55, %v866_v16  ;;  %v755_v43 = vadd.f32 %v727_v27, %v698_v8  ;;  %v840_v22 = vmul.f32 %v1148_v34, %v1421_v38  ;;  %v254_v23 = vsel %vm230_vm0, %v252_v15, %v253_v62 }
  0x63   : > { %v896_v11 = vmul.f32 %v1164_v44, %v339_v46  ;;  %v449_v24 = vmul.f32 %v1085_v1, %v254_v23  ;;  %v505_v47 = vmul.f32 %v1087_v2, %v1445_v21  ;;  %v642_v25 = vadd.f32 %v614_v50, %v1438_v59  ;;  %v1517_v59 = vld [vmem:[%s1100_s21 + $0x90] sm:$0xff] }
  0x64   : > { %950 = vst [vmem:[%s1217_s26 + $0x58] sm:$0x3f] %v922_v51  ;;  %v532_v29 = vadd.f32 %v504_v58, %v476_v13  ;;  %v811_v9 = vadd.f32 %v784_v17, %v755_v43  ;;  %v561_v27 = vmul.f32 %v1103_v5, %v394_v35  ;;  %v671_v63 = vmul.f32 %v1107_v7, %v1396_v10 }
  0x65   : > { %v477_v60 = vadd.f32 %v449_v24, %v421_v19  ;;  %v785_v40 = vmul.f32 %v1146_v33, %v254_v23  ;;  %v841_v32 = vmul.f32 %v1148_v34, %v1445_v21  ;;  %v255_v28 = vrot.slane %v1467_v36, 7 }
  0x66   : > { %v867_v57 = vadd.f32 %v840_v22, %v811_v9  ;;  %v699_v15 = vadd.f32 %v671_v63, %v642_v25  ;;  %v340_v61 = vrot.slane %v1467_v36, 1  ;;  %v341_v54 = vrot.slane %v1492_v31, 1 }
  0x67   : > { %v533_v0 = vadd.f32 %v505_v47, %v477_v60  ;;  %v309_v10 = vsel %vm230_vm0, 0.0, %v255_v28  ;;  %v422_v37 = vadd.f32 %v1093_v3, %v1517_v59  ;;  %v506_v20 = vmul.f32 %v1087_v2, %v1467_v36 }
  0x68   : > { %v923_v41 = vadd.f32 %v896_v11, %v867_v57  ;;  %v756_v42 = vadd.f32 %v728_v48, %v699_v15  ;;  %v342_v14 = vsel %vm315_vm1, %v340_v61, %v341_v54  ;;  %v450_v53 = vmul.f32 %v1085_v1, %v309_v10 }
  0x69   : > { %v588_v26 = vadd.f32 %v560_v39, %v532_v29  ;;  %v616_v50 = vmul.f32 %v1105_v6, %v254_v23  ;;  %v730_v46 = vmul.f32 %v1119_v12, %v394_v35  ;;  %v643_v49 = vadd.f32 %v615_v45, %v1462_v30  ;;  %v1542_v45 = vld [vmem:[%s1100_s21 + $0x98] sm:$0x3f] }
  0x6a   : > { %951 = vst [vmem:[%s1217_s26 + $0x60] sm:$0xff] %v923_v41  ;;  %v812_v52 = vadd.f32 %v785_v40, %v756_v42  ;;  %v897_v55 = vmul.f32 %v1164_v44, %v394_v35  ;;  %v478_v4 = vadd.f32 %v450_v53, %v422_v37  ;;  %v672_v48 = vmul.f32 %v1107_v7, %v1421_v38 }
  0x6b   : > { %v1535_v13 = vadd.f32 %v561_v27, %v533_v0  ;;  %v562_v58 = vmul.f32 %v1103_v5, %v342_v14  ;;  %v617_v39 = vmul.f32 %v1105_v6, %v309_v10  ;;  %v256_v16 = vrot.slane %v1492_v31, 7 }
  0x6c   : > { %v868_v8 = vadd.f32 %v841_v32, %v812_v52  ;;  %v534_v17 = vadd.f32 %v506_v20, %v478_v4  ;;  %v700_v30 = vadd.f32 %v672_v48, %v643_v49  ;;  %v786_v62 = vmul.f32 %v1146_v33, %v309_v10  ;;  %v1564_v32 = vld [vmem:[%s1100_s21 + $0xa0] sm:$0xff] }
  0x6d   : > { %v842_v35 = vmul.f32 %v1148_v34, %v1467_v36  ;;  %v257_v38 = vsel %vm230_vm0, %v255_v28, %v256_v16  ;;  %v395_v19 = vsel %vm386_vm2, %v341_v54, 0.0  ;;  %v423_v51 = vadd.f32 %v1093_v3, %v1542_v45  ;;  %v1589_v16 = vld [vmem:[%s1100_s21 + $0xa8] sm:$0x3f] }
  0x6e   : > { %v924_v43 = vadd.f32 %v897_v55, %v868_v8  ;;  %v757_v22 = vadd.f32 %v729_v18, %v700_v30  ;;  %v451_v23 = vmul.f32 %v1085_v1, %v257_v38  ;;  %v507_v11 = vmul.f32 %v1087_v2, %v1492_v31 }
  0x6f   : > { %v731_v24 = vmul.f32 %v1119_v12, %v342_v14  ;;  %v898_v47 = vmul.f32 %v1164_v44, %v342_v14  ;;  %v644_v25 = vadd.f32 %v616_v50, %v1485_v56  ;;  %v673_v29 = vmul.f32 %v1107_v7, %v1445_v21 }
  0x70   : > { %952 = vst [vmem:[%s1217_s26 + $0x68] sm:$0x3f] %v924_v43  ;;  %v1559_v9 = vadd.f32 %v562_v58, %v534_v17  ;;  %v813_v27 = vadd.f32 %v786_v62, %v757_v22  ;;  %v479_v63 = vadd.f32 %v451_v23, %v423_v51  ;;  %v563_v18 = vmul.f32 %v1103_v5, %v395_v19 }
  0x71   : > { %v701_v60 = vadd.f32 %v673_v29, %v644_v25  ;;  %v787_v40 = vmul.f32 %v1146_v33, %v257_v38  ;;  %v258_v28 = vrot.slane %v1517_v59, 7  ;;  %v343_v57 = vrot.slane %v1517_v59, 1 }
  0x72   : > { %v869_v56 = vadd.f32 %v842_v35, %v813_v27  ;;  %v535_v15 = vadd.f32 %v507_v11, %v479_v63  ;;  %v344_v21 = vrot.slane %v1542_v45, 1  ;;  %v424_v61 = vadd.f32 %v1093_v3, %v1564_v32 }
  0x73   : > { %v758_v54 = vadd.f32 %v730_v46, %v701_v60  ;;  %v843_v0 = vmul.f32 %v1148_v34, %v1492_v31  ;;  %v310_v10 = vsel %vm230_vm0, 0.0, %v258_v28  ;;  %v645_v37 = vadd.f32 %v617_v39, %v588_v26 }
  0x74   : > { %v925_v20 = vadd.f32 %v898_v47, %v869_v56  ;;  %v618_v41 = vmul.f32 %v1105_v6, %v257_v38  ;;  %v345_v42 = vsel %vm315_vm1, %v343_v57, %v344_v21  ;;  %v452_v14 = vmul.f32 %v1085_v1, %v310_v10 }
  0x75   : > { %v732_v53 = vmul.f32 %v1119_v12, %v395_v19  ;;  %v814_v50 = vadd.f32 %v787_v40, %v758_v54  ;;  %v899_v49 = vmul.f32 %v1164_v44, %v395_v19  ;;  %v674_v46 = vmul.f32 %v1107_v7, %v1467_v36 }
  0x76   : > { %953 = vst [vmem:[%s1217_s26 + $0x70] sm:$0xff] %v925_v20  ;;  %v1582_v52 = vadd.f32 %v563_v18, %v535_v15  ;;  %v480_v26 = vadd.f32 %v452_v14, %v424_v61  ;;  %v508_v55 = vmul.f32 %v1087_v2, %v1517_v59  ;;  %v564_v4 = vmul.f32 %v1103_v5, %v345_v42 }
  0x77   : > { %v870_v48 = vadd.f32 %v843_v0, %v814_v50  ;;  %v702_v58 = vadd.f32 %v674_v46, %v645_v37  ;;  %v788_v39 = vmul.f32 %v1146_v33, %v310_v10  ;;  %v259_v8 = vrot.slane %v1542_v45, 7 }
  0x78   : > { %v619_v36 = vmul.f32 %v1105_v6, %v310_v10  ;;  %v733_v17 = vmul.f32 %v1119_v12, %v345_v42  ;;  %v396_v30 = vsel %vm386_vm2, %v344_v21, 0.0  ;;  %v425_v62 = vadd.f32 %v1093_v3, %v1589_v16 }
  0x79   : > { %v926_v35 = vadd.f32 %v899_v49, %v870_v48  ;;  %v759_v38 = vadd.f32 %v731_v24, %v702_v58  ;;  %v844_v19 = vmul.f32 %v1148_v34, %v1517_v59  ;;  %v260_v51 = vsel %vm230_vm0, %v258_v28, %v259_v8  ;;  %v1639_v8 = vld [vmem:[%s1100_s21 + $0xb8] sm:$0x3f] }
  0x7a   : > { %v900_v43 = vmul.f32 %v1164_v44, %v345_v42  ;;  %v453_v22 = vmul.f32 %v1085_v1, %v260_v51  ;;  %v509_v23 = vmul.f32 %v1087_v2, %v1542_v45  ;;  %v646_v11 = vadd.f32 %v618_v41, %v1535_v13  ;;  %v1614_v13 = vld [vmem:[%s1100_s21 + $0xb0] sm:$0xff] }
  0x7b   : > { %954 = vst [vmem:[%s1217_s26 + $0x78] sm:$0x3f] %v926_v35  ;;  %v536_v47 = vadd.f32 %v508_v55, %v480_v26  ;;  %v815_v25 = vadd.f32 %v788_v39, %v759_v38  ;;  %v565_v24 = vmul.f32 %v1103_v5, %v396_v30  ;;  %v675_v29 = vmul.f32 %v1107_v7, %v1492_v31 }
  0x7c   : > { %v481_v27 = vadd.f32 %v453_v22, %v425_v62  ;;  %v789_v63 = vmul.f32 %v1146_v33, %v260_v51  ;;  %v845_v18 = vmul.f32 %v1148_v34, %v1542_v45  ;;  %v261_v60 = vrot.slane %v1564_v32, 7  ;;  %v1648_v62 = vld [vmem:[%s1810_s2] ss:$0 sm:$0xff] }
  0x7d   : > { %v871_v40 = vadd.f32 %v844_v19, %v815_v25  ;;  %v703_v28 = vadd.f32 %v675_v29, %v646_v11  ;;  %v346_v57 = vrot.slane %v1564_v32, 1  ;;  %v347_v56 = vrot.slane %v1589_v16, 1 }
  0x7e   : > { %v537_v15 = vadd.f32 %v509_v23, %v481_v27  ;;  %v311_v31 = vsel %vm230_vm0, 0.0, %v261_v60  ;;  %v426_v21 = vadd.f32 %v1093_v3, %v1614_v13  ;;  %v510_v61 = vmul.f32 %v1087_v2, %v1564_v32 }
  0x7f   : > { %v927_v54 = vadd.f32 %v900_v43, %v871_v40  ;;  %v760_v0 = vadd.f32 %v732_v53, %v703_v28  ;;  %v348_v10 = vsel %vm315_vm1, %v346_v57, %v347_v56  ;;  %v454_v37 = vmul.f32 %v1085_v1, %v311_v31 }
  0x80   : > { %v592_v20 = vadd.f32 %v564_v4, %v536_v47  ;;  %v620_v41 = vmul.f32 %v1105_v6, %v260_v51  ;;  %v734_v42 = vmul.f32 %v1119_v12, %v396_v30  ;;  %v647_v14 = vadd.f32 %v619_v36, %v1559_v9 }
  0x81   : > { %955 = vst [vmem:[%s1217_s26 + $0x80] sm:$0xff] %v927_v54  ;;  %v816_v50 = vadd.f32 %v789_v63, %v760_v0  ;;  %v901_v3 = vmul.f32 %v1164_v44, %v396_v30  ;;  %v482_v49 = vadd.f32 %v454_v37, %v426_v21  ;;  %v676_v53 = vmul.f32 %v1107_v7, %v1517_v59 }
  0x82   : > { %v1632_v46 = vadd.f32 %v565_v24, %v537_v15  ;;  %v566_v26 = vmul.f32 %v1103_v5, %v348_v10  ;;  %v621_v55 = vmul.f32 %v1105_v6, %v311_v31  ;;  %v262_v4 = vrot.slane %v1589_v16, 7 }
  0x83   : > { %v872_v48 = vadd.f32 %v845_v18, %v816_v50  ;;  %v538_v58 = vadd.f32 %v510_v61, %v482_v49  ;;  %v704_v39 = vadd.f32 %v676_v53, %v647_v14  ;;  %v790_v9 = vmul.f32 %v1146_v33, %v311_v31  ;;  %v1666_v18 = vld [vmem:[%s1100_s21 + $0xc0] sm:$0xff] }
  0x84   : > { %v846_v36 = vmul.f32 %v1148_v34, %v1564_v32  ;;  %v263_v59 = vsel %vm230_vm0, %v261_v60, %v262_v4  ;;  %v397_v30 = vsel %vm386_vm2, %v347_v56, 0.0  ;;  %v427_v35 = vadd.f32 %v1648_v62, %v1639_v8  ;;  %v1696_v4 = vld [vmem:[%s1100_s21 + $0xc8] sm:$0x3f] }
  0x85   : > { %v928_v38 = vadd.f32 %v901_v3, %v872_v48  ;;  %v761_v19 = vadd.f32 %v733_v17, %v704_v39  ;;  %v455_v51 = vmul.f32 %v1085_v1, %v263_v59  ;;  %v511_v43 = vmul.f32 %v1087_v2, %v1589_v16 }
  0x86   : > { %v735_v22 = vmul.f32 %v1119_v12, %v348_v10  ;;  %v902_v23 = vmul.f32 %v1164_v44, %v348_v10  ;;  %v648_v11 = vadd.f32 %v620_v41, %v1582_v52  ;;  %v677_v47 = vmul.f32 %v1107_v7, %v1542_v45  ;;  %v1684_v41 = vld [vmem:[%s1809_s1 + $0x8] ss:$0 sm:$0xff] }
  0x87   : > { %956 = vst [vmem:[%s1217_s26 + $0x88] sm:$0x3f] %v928_v38  ;;  %v1661_v25 = vadd.f32 %v566_v26, %v538_v58  ;;  %v817_v24 = vadd.f32 %v790_v9, %v761_v19  ;;  %v483_v29 = vadd.f32 %v455_v51, %v427_v35  ;;  %v567_v17 = vmul.f32 %v1103_v5, %v397_v30 }
  0x88   : > { %v705_v27 = vadd.f32 %v677_v47, %v648_v11  ;;  %v791_v63 = vmul.f32 %v1146_v33, %v263_v59  ;;  %v264_v60 = vrot.slane %v1614_v13, 7  ;;  %v349_v44 = vrot.slane %v1614_v13, 1 }
  0x89   : > { %v873_v52 = vadd.f32 %v846_v36, %v817_v24  ;;  %v539_v40 = vadd.f32 %v511_v43, %v483_v29  ;;  %v350_v45 = vrot.slane %v1639_v8, 1  ;;  %v428_v28 = vadd.f32 %v1648_v62, %v1666_v18  ;;  %v1717_v24 = vld [vmem:[%s1100_s21 + $0xd0] sm:$0xff] }
  0x8a   : > { %v762_v57 = vadd.f32 %v734_v42, %v705_v27  ;;  %v847_v56 = vmul.f32 %v1148_v34, %v1589_v16  ;;  %v312_v15 = vsel %vm230_vm0, 0.0, %v264_v60  ;;  %v649_v31 = vadd.f32 %v621_v55, %v592_v20 }
  0x8b   : > { %v929_v21 = vadd.f32 %v902_v23, %v873_v52  ;;  %v351_v61 = vsel %vm315_vm1, %v349_v44, %v350_v45  ;;  %v456_v54 = vmul.f32 %v1085_v1, %v312_v15  ;;  %v512_v0 = vmul.f32 %v1087_v2, %v1614_v13 }
  0x8c   : > { %v622_v10 = vmul.f32 %v1105_v6, %v263_v59  ;;  %v818_v37 = vadd.f32 %v791_v63, %v762_v57  ;;  %v903_v42 = vmul.f32 %v1684_v41, %v397_v30  ;;  %v678_v20 = vmul.f32 %v1107_v7, %v1564_v32 }
  0x8d   : > { %957 = vst [vmem:[%s1217_s26 + $0x90] sm:$0xff] %v929_v21  ;;  %v1690_v14 = vadd.f32 %v567_v17, %v539_v40  ;;  %v736_v50 = vmul.f32 %v1119_v12, %v397_v30  ;;  %v484_v3 = vadd.f32 %v456_v54, %v428_v28  ;;  %v568_v49 = vmul.f32 %v1103_v5, %v351_v61 }
  0x8e   : > { %v874_v53 = vadd.f32 %v847_v56, %v818_v37  ;;  %v706_v26 = vadd.f32 %v678_v20, %v649_v31  ;;  %v792_v55 = vmul.f32 %v1146_v33, %v312_v15  ;;  %v265_v48 = vrot.slane %v1639_v8, 7 }
  0x8f   : > { %v540_v58 = vadd.f32 %v512_v0, %v484_v3  ;;  %v623_v32 = vmul.f32 %v1105_v6, %v312_v15  ;;  %v398_v39 = vsel %vm386_vm2, %v350_v45, 0.0  ;;  %v429_v9 = vadd.f32 %v1648_v62, %v1696_v4 }
  0x90   : > { %v930_v36 = vadd.f32 %v903_v42, %v874_v53  ;;  %v763_v59 = vadd.f32 %v735_v22, %v706_v26  ;;  %v848_v30 = vmul.f32 %v1148_v34, %v1614_v13  ;;  %v266_v35 = vsel %vm230_vm0, %v264_v60, %v265_v48 }
  0x91   : > { %v737_v38 = vmul.f32 %v1119_v12, %v351_v61  ;;  %v457_v19 = vmul.f32 %v1085_v1, %v266_v35  ;;  %v513_v51 = vmul.f32 %v1087_v2, %v1639_v8  ;;  %v650_v43 = vadd.f32 %v622_v10, %v1632_v46 }
  0x92   : > { %958 = vst [vmem:[%s1217_s26 + $0x98] sm:$0x3f] %v930_v36  ;;  %v819_v23 = vadd.f32 %v792_v55, %v763_v59  ;;  %v904_v11 = vmul.f32 %v1684_v41, %v351_v61  ;;  %v569_v22 = vmul.f32 %v1103_v5, %v398_v39  ;;  %v679_v47 = vmul.f32 %v1107_v7, %v1589_v16 }
  0x93   : > { %v596_v29 = vadd.f32 %v568_v49, %v540_v58  ;;  %v485_v17 = vadd.f32 %v457_v19, %v429_v9  ;;  %v793_v27 = vmul.f32 %v1146_v33, %v266_v35  ;;  %v267_v63 = vrot.slane %v1666_v18, 7 }
  0x94   : > { %v875_v60 = vadd.f32 %v848_v30, %v819_v23  ;;  %v707_v46 = vadd.f32 %v679_v47, %v650_v43  ;;  %v352_v44 = vrot.slane %v1666_v18, 1  ;;  %v353_v52 = vrot.slane %v1696_v4, 1 }
  0x95   : > { %v541_v40 = vadd.f32 %v513_v51, %v485_v17  ;;  %v849_v45 = vmul.f32 %v1148_v34, %v1639_v8  ;;  %v313_v16 = vsel %vm230_vm0, 0.0, %v267_v63  ;;  %v430_v28 = vadd.f32 %v1648_v62, %v1717_v24 }
  0x96   : > { %v931_v57 = vadd.f32 %v904_v11, %v875_v60  ;;  %v764_v56 = vadd.f32 %v736_v50, %v707_v46  ;;  %v354_v15 = vsel %vm315_vm1, %v352_v44, %v353_v52  ;;  %v458_v31 = vmul.f32 %v1085_v1, %v313_v16  ;;  %v1740_v50 = vld [vmem:[%s1100_s21 + $0xd8] sm:$0x3f] }
  0x97   : > { %v624_v21 = vmul.f32 %v1105_v6, %v266_v35  ;;  %v738_v61 = vmul.f32 %v1119_v12, %v398_v39  ;;  %v905_v54 = vmul.f32 %v1684_v41, %v398_v39  ;;  %v651_v0 = vadd.f32 %v623_v32, %v1661_v25 }
  0x98   : > { %959 = vst [vmem:[%s1217_s26 + $0xa0] sm:$0xff] %v931_v57  ;;  %v597_v10 = vadd.f32 %v569_v22, %v541_v40  ;;  %v820_v37 = vadd.f32 %v793_v27, %v764_v56  ;;  %v514_v42 = vmul.f32 %v1087_v2, %v1666_v18  ;;  %v680_v20 = vmul.f32 %v1107_v7, %v1614_v13 }
  0x99   : > { %v486_v3 = vadd.f32 %v458_v31, %v430_v28  ;;  %v570_v49 = vmul.f32 %v1103_v5, %v354_v15  ;;  %v625_v53 = vmul.f32 %v1105_v6, %v313_v16  ;;  %v268_v26 = vrot.slane %v1696_v4, 7 }
  0x9a   : > { %v876_v55 = vadd.f32 %v849_v45, %v820_v37  ;;  %v708_v25 = vadd.f32 %v680_v20, %v651_v0  ;;  %v739_v48 = vmul.f32 %v1119_v12, %v354_v15  ;;  %v794_v58 = vmul.f32 %v1146_v33, %v313_v16 }
  0x9b   : > { %v850_v32 = vmul.f32 %v1148_v34, %v1666_v18  ;;  %v269_v13 = vsel %vm230_vm0, %v267_v63, %v268_v26  ;;  %v399_v39 = vsel %vm386_vm2, %v353_v52, 0.0  ;;  %v431_v9 = vadd.f32 %v1648_v62, %v1740_v50 }
  0x9c   : > { %v932_v36 = vadd.f32 %v905_v54, %v876_v55  ;;  %v765_v59 = vadd.f32 %v737_v38, %v708_v25  ;;  %v459_v30 = vmul.f32 %v1085_v1, %v269_v13  ;;  %v515_v35 = vmul.f32 %v1087_v2, %v1696_v4 }
  0x9d   : > { %v542_v19 = vadd.f32 %v514_v42, %v486_v3  ;;  %v906_v51 = vmul.f32 %v1684_v41, %v354_v15  ;;  %v652_v43 = vadd.f32 %v624_v21, %v1690_v14  ;;  %v681_v23 = vmul.f32 %v1107_v7, %v1639_v8 }
  0x9e   : > { %960 = vst [vmem:[%s1217_s26 + $0xa8] sm:$0x3f] %v932_v36  ;;  %v821_v11 = vadd.f32 %v794_v58, %v765_v59  ;;  %v487_v22 = vadd.f32 %v459_v30, %v431_v9  ;;  %v571_v62 = vmul.f32 %v1103_v5, %v399_v39  ;;  %v626_v38 = vmul.f32 %v1105_v6, %v269_v13 }
  0x9f   : > { %v709_v47 = vadd.f32 %v681_v23, %v652_v43  ;;  %v795_v1 = vmul.f32 %v1146_v33, %v269_v13  ;;  %v851_v2 = vmul.f32 %v1148_v34, %v1696_v4  ;;  %v270_v17 = vrot.slane %v1717_v24, 7 }
  0xa0   : > { %v877_v27 = vadd.f32 %v850_v32, %v821_v11  ;;  %v543_v14 = vadd.f32 %v515_v35, %v487_v22  ;;  %v355_v8 = vrot.slane %v1717_v24, 1  ;;  %v653_v63 = vadd.f32 %v625_v53, %v596_v29 }
  0xa1   : > { %v766_v60 = vadd.f32 %v738_v61, %v709_v47  ;;  %v314_v46 = vsel %vm230_vm0, 0.0, %v270_v17  ;;  %v356_v5 = vrot.slane %v1740_v50, 1  ;;  %v682_v44 = vmul.f32 %v1107_v7, %v1666_v18 }
  0xa2   : > { %v598_v52 = vadd.f32 %v570_v49, %v542_v19  ;;  %v933_v40 = vadd.f32 %v906_v51, %v877_v27  ;;  %v740_v45 = vmul.f32 %v1119_v12, %v399_v39  ;;  %v627_v16 = vmul.f32 %v1105_v6, %v314_v46 }
  0xa3   : > { %v822_v28 = vadd.f32 %v795_v1, %v766_v60  ;;  %v907_v57 = vmul.f32 %v1684_v41, %v399_v39  ;;  %v710_v56 = vadd.f32 %v682_v44, %v653_v63  ;;  %v796_v29 = vmul.f32 %v1146_v33, %v314_v46 }
  0xa4   : > { %961 = vst [vmem:[%s1217_s26 + $0xb0] sm:$0xff] %v933_v40  ;;  %v599_v15 = vadd.f32 %v571_v62, %v543_v14  ;;  %v852_v31 = vmul.f32 %v1148_v34, %v1717_v24  ;;  %v271_v21 = vrot.slane %v1740_v50, 7  ;;  %v654_v18 = vadd.f32 %v626_v38, %v597_v10 }
  0xa5   : > { %v878_v61 = vadd.f32 %v851_v2, %v822_v28  ;;  %v357_v54 = vsel %vm315_vm1, %v355_v8, %v356_v5  ;;  %v767_v0 = vadd.f32 %v739_v48, %v710_v56  ;;  %v683_v37 = vmul.f32 %v1107_v7, %v1696_v4 }
  0xa6   : > { %v908_v42 = vmul.f32 %v1684_v41, %v357_v54  ;;  %v272_v20 = vsel %vm230_vm0, %v270_v17, %v271_v21  ;;  %v400_v3 = vsel %vm386_vm2, %v356_v5, 0.0  ;;  %v655_v49 = vadd.f32 %v627_v16, %v598_v52 }
  0xa7   : > { %v934_v53 = vadd.f32 %v907_v57, %v878_v61  ;;  %v823_v26 = vadd.f32 %v796_v29, %v767_v0  ;;  %v628_v55 = vmul.f32 %v1105_v6, %v272_v20  ;;  %v711_v10 = vadd.f32 %v683_v37, %v654_v18 }
  0xa8   : > { %v741_v25 = vmul.f32 %v1119_v12, %v357_v54  ;;  %v797_v58 = vmul.f32 %v1146_v33, %v272_v20  ;;  %v684_v48 = vmul.f32 %v1107_v7, %v1717_v24  ;;  %v853_v13 = vmul.f32 %v1148_v34, %v1740_v50 }
  0xa9   : > { %962 = vst [vmem:[%s1217_s26 + $0xb8] sm:$0x3f] %v934_v53  ;;  %v879_v4 = vadd.f32 %v852_v31, %v823_v26  ;;  %v768_v32 = vadd.f32 %v740_v45, %v711_v10  ;;  %v656_v39 = vadd.f32 %v628_v55, %v599_v15  ;;  %v742_v9 = vmul.f32 %v1119_v12, %v400_v3 }
  0xaa   : > { %v712_v36 = vadd.f32 %v684_v48, %v655_v49  ;;  %v798_v6 = vmul.f32 0.0, %v1146_v33  ;;  %v685_v59 = vmul.f32 %v1107_v7, %v1740_v50  ;;  %v909_v24 = vmul.f32 %v1684_v41, %v400_v3 }
  0xab   : > { %v935_v30 = vadd.f32 %v908_v42, %v879_v4  ;;  %v824_v35 = vadd.f32 %v797_v58, %v768_v32  ;;  %v854_v51 = vmul.f32 0.0, %v1148_v34  ;;  %v910_v11 = vmul.f32 0.0, %v1684_v41 }
  0xac   : > { %v769_v19 = vadd.f32 %v741_v25, %v712_v36  ;;  %v713_v43 = vadd.f32 %v685_v59, %v656_v39 }
  0xad   : > { %963 = vst [vmem:[%s1217_s26 + $0xc0] sm:$0xff] %v935_v30  ;;  %v880_v23 = vadd.f32 %v853_v13, %v824_v35 }
  0xae   : > { %v825_v12 = vadd.f32 %v798_v6, %v769_v19  ;;  %v770_v33 = vadd.f32 %v742_v9, %v713_v43 }
  0xaf   : > { %v936_v22 = vadd.f32 %v909_v24, %v880_v23 }
  0xb0   : > { %v881_v62 = vadd.f32 %v854_v51, %v825_v12  ;;  %v826_v38 = vadd.f32 %v798_v6, %v770_v33 }
  0xb1   : > { %964 = vst [vmem:[%s1217_s26 + $0xc8] sm:$0x3f] %v936_v22 }
  0xb2   : > { %v937_v7 = vadd.f32 %v910_v11, %v881_v62  ;;  %v882_v50 = vadd.f32 %v854_v51, %v826_v38 }
  0xb4   : > { %965 = vst [vmem:[%s1217_s26 + $0xd0] sm:$0xff] %v937_v7  ;;  %v938_v47 = vadd.f32 %v910_v11, %v882_v50 }
  0xb6   : > { %966 = vst [vmem:[%s1217_s26 + $0xd8] sm:$0x3f] %v938_v47 }
  0xb7 PF: > { %s13_s12 = sadd.s32 1, %s1050_s12  }
  0xb8   : > { %p10_p4 = scmp.ge.s32.totalorder %s13_s12, 4  }
  0xba   :  { %12 = sbr.rel (!%p10_p4) target bundleno = 1 (0x1), region = 62 }

</bundles_post_ra>
